<compile_context>
chip_gen: v5e
topology: v5e:2x2
jax: 0.10.0
libtpu: 0.0.40
codegen_flags: <defaults>
</compile_context>

<pallas_src>
import functools

import jax
import jax.numpy as jnp
from jax.experimental import pallas as pl
from jax.experimental.pallas import tpu as pltpu


def _round_up(x, m):
    return ((x + m - 1) // m) * m


def _vmem_limit_bytes():
    """Generation-aware scoped VMEM limit (leave ~16 MiB compiler headroom)."""
    try:
        info = pltpu.get_tpu_info()
        cap = int(getattr(info, "vmem_capacity_bytes", 64 << 20))
    except Exception:
        cap = 64 << 20          # conservative: v7x physical VMEM per TensorCore
    limit = min(cap - (16 << 20), 96 << 20)
    return int(max(limit, 32 << 20))


def _choose_tile_rows(batch, feat, x_dtype, lbl_dtype, budget_bytes, buffers=2):
    """Rows per tile so 2 inputs x `buffers` pipeline buffers fit `budget_bytes`.

    Layout-aware: lanes padded to 128, rows rounded to the dtype's sublane
    packing (8 for 4-byte, 16 for 2-byte, 32 for 1-byte dtypes).
    """
    item = jnp.dtype(x_dtype).itemsize
    sub = {1: 32, 2: 16, 4: 8}.get(item, 8)
    if batch <= sub:
        return batch                               # single full-dim block
    lanes = _round_up(feat, 128)
    lbl_item = jnp.dtype(lbl_dtype).itemsize
    per_row = 2 * lanes * item + 128 * lbl_item    # two inputs + label column
    tb = budget_bytes // max(1, buffers * per_row)
    tb = max(sub, (tb // sub) * sub)
    tb = min(tb, (batch // sub) * sub)             # never exceed the array dim
    return int(tb)


def _contrastive_kernel(x1_ref, x2_ref, lbl_ref, out_ref, *,
                        margin, batch_size, tile_rows, steps_per_core, need_mask):
    c = pl.program_id(0)          # core-split index (outer, "parallel")
    i = pl.program_id(1)          # tile step within this core (inner, "arbitrary")

    @pl.when(i == 0)
    def _():
        out_ref[...] = jnp.zeros_like(out_ref)

    x1 = x1_ref[...].astype(jnp.float32)           # (tb, D)
    x2 = x2_ref[...].astype(jnp.float32)           # (tb, D)
    lbl = lbl_ref[...].astype(jnp.float32)         # (tb, 1)

    # F.pairwise_distance adds eps=1e-6 to the difference before the norm.
    diff = x1 - x2 + jnp.float32(1e-6)
    sq_sum = jnp.sum(diff * diff, axis=-1, keepdims=True)   # (tb, 1) == d^2
    dist = jnp.sqrt(sq_sum)
    hinge = jnp.maximum(jnp.float32(margin) - dist, jnp.float32(0.0))
    per_sample = (jnp.float32(1.0) - lbl) * sq_sum + lbl * (hinge * hinge)

    if need_mask:
        # Rows past the true batch (ragged last tile / duplicated clamped tile)
        # are selected to exactly 0 so stale VMEM contents cannot leak NaN/Inf.
        t_global = c * steps_per_core + i
        row = (jax.lax.broadcasted_iota(jnp.int32, per_sample.shape, 0)
               + t_global * tile_rows)
        per_sample = jnp.where(row < batch_size, per_sample, jnp.float32(0.0))

    partial = jnp.sum(per_sample, keepdims=True)             # (1, 1)
    out_ref[...] += jnp.broadcast_to(partial, out_ref.shape)  # per-core accumulator


def contrastive_loss(output1, output2, label, margin=1.0, *, tile_rows=None):
    """Pallas TPU implementation of ContrastiveLoss.forward.

    output1, output2: (B, D) float arrays (any float dtype, streamed as-is)
    label:            (B,)   float array (0/1)
    returns: scalar float32 loss
    """
    B, D = output1.shape
    limit = _vmem_limit_bytes()
    if tile_rows is None:
        tb = _choose_tile_rows(B, D, output1.dtype, label.dtype, (3 * limit) // 4)
    else:
        tb = int(tile_rows)       # testing hook

    num_tiles = pl.cdiv(B, tb)
    ncores = 2 if num_tiles >= 2 else 1            # 2-way split (uses both TCs on v7x)
    spc = pl.cdiv(num_tiles, ncores)               # tile steps per core
    covered_rows = ncores * spc * tb
    need_mask = covered_rows > B                   # ragged or duplicated coverage
    clamp = ncores * spc > num_tiles               # odd tile count -> clamp index

    label2d = label.reshape(B, 1)

    def tile_idx(c, i):
        t = c * spc + i
        if clamp:
            t = jnp.minimum(t, num_tiles - 1)      # duplicated tile is fully masked
        return t

    kernel = functools.partial(
        _contrastive_kernel, margin=float(margin), batch_size=B,
        tile_rows=tb, steps_per_core=spc, need_mask=need_mask)

    out = pl.pallas_call(
        kernel,
        # One (8,128) partial-sum block per core (layout-conforming, tiny).
        out_shape=jax.ShapeDtypeStruct((8 * ncores, 128), jnp.float32),
        grid_spec=pltpu.PrefetchScalarGridSpec(
            num_scalar_prefetch=0,
            grid=(ncores, spc),
            in_specs=[
                pl.BlockSpec((tb, D), lambda c, i: (tile_idx(c, i), 0)),
                pl.BlockSpec((tb, D), lambda c, i: (tile_idx(c, i), 0)),
                pl.BlockSpec((tb, 1), lambda c, i: (tile_idx(c, i), 0)),
            ],
            out_specs=pl.BlockSpec((8, 128), lambda c, i: (c, 0)),
        ),
        compiler_params=pltpu.CompilerParams(
            # Outer axis shards across TensorCores (v7x); inner axis carries
            # each core's resident output accumulator.
            dimension_semantics=("parallel", "arbitrary"),
            vmem_limit_bytes=int(limit),
        ),
    )(output1, output2, label2d)

    # Every element of a core's (8,128) block holds that core's partial sum.
    partials = out[0::8, 0]
    return jnp.sum(partials) / jnp.float32(B)


def contrastive_loss_ref(output1, output2, label, margin=1.0):
    """Pure-JAX reference mirroring the PyTorch semantics."""
    diff = output1.astype(jnp.float32) - output2.astype(jnp.float32) + 1e-6
    dist = jnp.sqrt(jnp.sum(diff * diff, axis=-1))
    hinge = jnp.maximum(margin - dist, 0.0)
    return jnp.mean((1.0 - label) * dist**2 + label * hinge**2)


if __name__ == "__main__":
    key = jax.random.PRNGKey(0)

    # Test 1: single-tile path (B=8, D=32).
    k1, k2, k3, k4, k5, k6 = jax.random.split(key, 6)
    B, D = 8, 32
    o1 = jax.random.normal(k1, (B, D), dtype=jnp.float32)
    o2 = jax.random.normal(k2, (B, D), dtype=jnp.float32)
    lbl = jax.random.bernoulli(k3, 0.5, (B,)).astype(jnp.float32)

    loss = jax.block_until_ready(contrastive_loss(o1, o2, lbl, margin=1.0))
    ref = contrastive_loss_ref(o1, o2, lbl, margin=1.0)
    assert jnp.allclose(loss, ref, rtol=1e-5, atol=1e-5), (loss, ref)

    # Test 2: multi-tile + ragged last tile + 2-way core split + clamped index
    # (tile_rows=8 -> 3 tiles of B=19 split over a (2, 2) grid).
    B2, D2 = 19, 40
    p1 = jax.random.normal(k4, (B2, D2), dtype=jnp.float32)
    p2 = jax.random.normal(k5, (B2, D2), dtype=jnp.float32)
    lbl2 = jax.random.bernoulli(k6, 0.5, (B2,)).astype(jnp.float32)

    loss2 = jax.block_until_ready(
        contrastive_loss(p1, p2, lbl2, margin=1.0, tile_rows=8))
    ref2 = contrastive_loss_ref(p1, p2, lbl2, margin=1.0)
    assert jnp.allclose(loss2, ref2, rtol=1e-5, atol=1e-5), (loss2, ref2)

    print("KERNEL_OK")
</pallas_src>

<mosaic_0001>
module attributes {stable_mosaic.version = 11 : i64} {
  func.func @_contrastive_kernel(%arg0: i32, %arg1: i32, %arg2: memref<8x32xf32, #tpu.memory_space<vmem>>, %arg3: memref<8x32xf32, #tpu.memory_space<vmem>>, %arg4: memref<8x1xf32, #tpu.memory_space<vmem>>, %arg5: memref<8x128xf32, #tpu.memory_space<vmem>>) attributes {dimension_semantics = [#tpu.dimension_semantics<parallel>, #tpu.dimension_semantics<arbitrary>], iteration_bounds = array<i64: 1, 1>, scalar_prefetch = 0 : i64, scratch_operands = 0 : i64, tpu.core_type = #tpu.core_type<tc>, window_params = [{transform_indices = @transform_0, window_bounds = array<i64: 8, 32>}, {transform_indices = @transform_1, window_bounds = array<i64: 8, 32>}, {transform_indices = @transform_2, window_bounds = array<i64: 8, 1>}, {transform_indices = @transform_3, window_bounds = array<i64: 8, 128>}]} {
    %c0_i32 = arith.constant 0 : i32
    %0 = arith.cmpi eq, %arg1, %c0_i32 : i32
    %1 = arith.extui %0 : i1 to i32
    %c0_i32_0 = arith.constant 0 : i32
    %2 = arith.cmpi ne, %1, %c0_i32_0 : i32
    scf.if %2 {
      %cst_15 = arith.constant 0.000000e+00 : f32
      %33 = vector.broadcast %cst_15 : f32 to vector<8x128xf32>
      %c0_16 = arith.constant 0 : index
      %c0_17 = arith.constant 0 : index
      %34 = vector.load %arg5[%c0_16, %c0_17] : memref<8x128xf32, #tpu.memory_space<vmem>>, vector<8x128xf32>
      tpu.vector_store %arg5[%c0_16, %c0_17], %33 {strides = array<i32>} : memref<8x128xf32, #tpu.memory_space<vmem>>, vector<8x128xf32>,
    } else {
    }
    %c0 = arith.constant 0 : index
    %c0_1 = arith.constant 0 : index
    %3 = vector.load %arg2[%c0, %c0_1] : memref<8x32xf32, #tpu.memory_space<vmem>>, vector<8x32xf32>
    %c0_2 = arith.constant 0 : index
    %c0_3 = arith.constant 0 : index
    %4 = vector.load %arg3[%c0_2, %c0_3] : memref<8x32xf32, #tpu.memory_space<vmem>>, vector<8x32xf32>
    %c0_4 = arith.constant 0 : index
    %c0_5 = arith.constant 0 : index
    %5 = vector.load %arg4[%c0_4, %c0_5] : memref<8x1xf32, #tpu.memory_space<vmem>>, vector<8x1xf32>
    %6 = arith.subf %3, %4 : vector<8x32xf32>
    %cst = arith.constant 9.99999997E-7 : f32
    %7 = vector.broadcast %cst : f32 to vector<8x32xf32>
    %8 = arith.addf %6, %7 : vector<8x32xf32>
    %9 = arith.mulf %8, %8 : vector<8x32xf32>
    %cst_6 = arith.constant dense<0.000000e+00> : vector<8xf32>
    %10 = vector.multi_reduction <add>, %9, %cst_6 [1] : vector<8x32xf32> to vector<8xf32>
    %11 = vector.shape_cast %10 : vector<8xf32> to vector<8x1xf32>
    %12 = math.sqrt %11 : vector<8x1xf32>
    %cst_7 = arith.constant 1.000000e+00 : f32
    %13 = vector.broadcast %cst_7 : f32 to vector<8x1xf32>
    %14 = arith.subf %13, %12 : vector<8x1xf32>
    %cst_8 = arith.constant 0.000000e+00 : f32
    %15 = vector.broadcast %cst_8 : f32 to vector<8x1xf32>
    %16 = arith.maximumf %14, %15 : vector<8x1xf32>
    %cst_9 = arith.constant 1.000000e+00 : f32
    %17 = vector.broadcast %cst_9 : f32 to vector<8x1xf32>
    %18 = arith.subf %17, %5 : vector<8x1xf32>
    %19 = arith.mulf %18, %11 : vector<8x1xf32>
    %20 = arith.mulf %16, %16 : vector<8x1xf32>
    %21 = arith.mulf %5, %20 : vector<8x1xf32>
    %22 = arith.addf %19, %21 : vector<8x1xf32>
    %23 = vector.shape_cast %22 : vector<8x1xf32> to vector<1x8x1xf32>
    %cst_10 = arith.constant dense<0.000000e+00> : vector<1xf32>
    %24 = vector.multi_reduction <add>, %23, %cst_10 [1, 2] : vector<1x8x1xf32> to vector<1xf32>
    %25 = vector.shape_cast %24 : vector<1xf32> to vector<1x1x1xf32>
    %26 = vector.extract %25[0, 0, 0] : f32 from vector<1x1x1xf32>
    %27 = vector.broadcast %26 : f32 to vector<1x1xf32>
    %c0_11 = arith.constant 0 : index
    %c0_12 = arith.constant 0 : index
    %28 = vector.load %arg5[%c0_11, %c0_12] : memref<8x128xf32, #tpu.memory_space<vmem>>, vector<8x128xf32>
    %29 = vector.shape_cast %27 : vector<1x1xf32> to vector<1x1xf32>
    %30 = vector.broadcast %29 : vector<1x1xf32> to vector<8x128xf32>
    %31 = arith.addf %28, %30 : vector<8x128xf32>
    %c0_13 = arith.constant 0 : index
    %c0_14 = arith.constant 0 : index
    %32 = vector.load %arg5[%c0_13, %c0_14] : memref<8x128xf32, #tpu.memory_space<vmem>>, vector<8x128xf32>
    tpu.vector_store %arg5[%c0_13, %c0_14], %31 {strides = array<i32>} : memref<8x128xf32, #tpu.memory_space<vmem>>, vector<8x128xf32>,
    return
  }
  func.func @transform_0(%arg0: i32, %arg1: i32) -> (i32, i32) {
    %c1_i32 = arith.constant 1 : i32
    %0 = arith.muli %arg0, %c1_i32 : i32
    %1 = arith.addi %0, %arg1 : i32
    %c0_i32 = arith.constant 0 : i32
    %c0_i32_0 = arith.constant 0 : i32
    return %1, %c0_i32 : i32, i32
  }
  func.func @transform_1(%arg0: i32, %arg1: i32) -> (i32, i32) {
    %c1_i32 = arith.constant 1 : i32
    %0 = arith.muli %arg0, %c1_i32 : i32
    %1 = arith.addi %0, %arg1 : i32
    %c0_i32 = arith.constant 0 : i32
    %c0_i32_0 = arith.constant 0 : i32
    return %1, %c0_i32 : i32, i32
  }
  func.func @transform_2(%arg0: i32, %arg1: i32) -> (i32, i32) {
    %c1_i32 = arith.constant 1 : i32
    %0 = arith.muli %arg0, %c1_i32 : i32
    %1 = arith.addi %0, %arg1 : i32
    %c0_i32 = arith.constant 0 : i32
    %c0_i32_0 = arith.constant 0 : i32
    return %1, %c0_i32 : i32, i32
  }
  func.func @transform_3(%arg0: i32, %arg1: i32) -> (i32, i32) {
    %c0_i32 = arith.constant 0 : i32
    %c0_i32_0 = arith.constant 0 : i32
    return %arg0, %c0_i32 : i32, i32
  }
}

</mosaic_0001>

<bundles_post_ra>
// kernel: tpu_custom_call.1
= control target key start
LH: loop header
LB: loop body
LE: loop exit
PB: predicated region body
PF: predicated region fallthrough
CT: control target
= control target key end

     0   :  { %8 = vsyncpa [#allocation3], 0  ;;  %s238_s0 = inlined_call_operand.vmem [shape: f32[8,32], index: 0, kind: input, shape index: {}]   ;;  %s239_s1 = inlined_call_operand.hbm [shape: f32[8,32], index: 1, kind: input, shape index: {}]   ;;  %s240_s2 = inlined_call_operand.vmem [shape: f32[8,1], index: 2, kind: input, shape index: {}]   ;;  %s241_s3 = inlined_call_operand.hbm [shape: f32[8,128], index: 3, kind: output, shape index: {}]  }
   0x1   :  { %9 = vsyncpa [#allocation4], 0  ;;  %s26_s14 = sshll.u32 %s239_s1, 4  ;;  %s204_s15 = smov [#allocation2]   ;;  %s27_s14 = int_to_ptr.hbm [resolvable:$true] %s26_s14 }
   0x2   :  { %s28_s16 = sshll.u32 %s204_s15, 4  ;;  %s29_s16 = int_to_ptr.vmem [resolvable:$true] %s28_s16 }
   0x3   :  { %31 = dma.hbm_to_vmem [thread:$0]  %s27_s14, 128, %s29_s16, [#allocation3]  }
   0x4   :  { %200 = dma.done.wait [#allocation3], 128  }
   0x5   :  { %201 = vsyncadd [#allocation3], 4294967168  ;;  %v72_v0 = vld [vmem:[%s238_s0] sm:$0xff]  ;;  %vm78_vm0 = vcmask 261120   ;;  %vm101_vm3 = vcmask 7168   ;;  %s123_s22 = sshll.u32 %s241_s3, 4  ;;  %s124_s22 = int_to_ptr.hbm [resolvable:$true] %s123_s22 }
   0x6   :  { %v73_v1 = vld [vmem:[#allocation2] sm:$0xff] }
   0x7   :  { %v75_v2 = vsub.f32 %v72_v0, %v73_v1  ;;  %v74_v16 = vld [vmem:[%s240_s2] sm:$0xff]  ;;  %s205_s2 = smov [#allocation5]  }
   0x8   :  { %v96_v20 = vsub.f32 1.0, %v74_v16  ;;  %s121_s19 = sshll.u32 %s205_s2, 4  ;;  %s122_s19 = int_to_ptr.vmem [resolvable:$true] %s121_s19 }
   0x9   :  { %v76_v3 = vadd.f32 1e-06, %v75_v2 }
   0xb   :  { %v77_v4 = vmul.f32 %v76_v3, %v76_v3 }
   0xd   :  { %v79_v5 = vsel %vm78_vm0, %v77_v4, 0.0 }
   0xe   :  { %80 = vadd.xlane.f32.xlu0 %v79_v5 }
  0x81   :  { %v81_v6 = vpop.xlane.xlu0 %80 }
  0x82   :  { %150 = vrsqrt.f32 %v81_v6  ;;  %vm89_vm1 = vcmp.eq.f32.partialorder %v81_v6, inf  ;;  %v92_v14 = vand.u32 2147483648, %v81_v6  ;;  %vm91_vm2 = vcmp.eq.f32.partialorder %v81_v6, 0.0 }
  0x83   :  { %v97_v22 = vmul.f32 %v96_v20, %v81_v6 }
  0x88   :  { %v151_v7 = vpop.eup %150 }
  0x89   :  { %v83_v8 = vmul.f32 %v151_v7, %v81_v6 }
  0x8b   :  { %v84_v9 = vmul.f32 %v151_v7, %v83_v8 }
  0x8d   :  { %v85_v10 = vmul.f32 0.5, %v84_v9 }
  0x8f   :  { %v86_v11 = vsub.f32 1.5, %v85_v10 }
  0x91   :  { %v87_v12 = vmul.f32 %v151_v7, %v86_v11 }
  0x93   :  { %v88_v13 = vmul.f32 %v87_v12, %v81_v6 }
  0x95   :  { %v90_v15 = vsel %vm89_vm1, %v81_v6, %v88_v13 }
  0x96   :  { %v93_v17 = vsel %vm91_vm2, %v92_v14, %v90_v15 }
  0x97   :  { %v94_v18 = vsub.f32 1.0, %v93_v17 }
  0x99   :  { %v95_v19 = vmax.f32 %v94_v18, 0.0 }
  0x9b   :  { %v98_v21 = vmul.f32 %v95_v19, %v95_v19 }
  0x9d   :  { %v99_v23 = vmul.f32 %v98_v21, %v74_v16 }
  0x9f   :  { %v100_v24 = vadd.f32 %v99_v23, %v97_v22 }
  0xa1   :  { %v102_v25 = vsel %vm101_vm3, %v100_v24, 0.0 }
  0xa2   :  { %103 = vadd.xlane.f32.xlu0 %v102_v25 }
 0x115   :  { %v104_v26 = vpop.xlane.xlu0 %103 }
 0x116   :  { %v105_v27 = vrot.slane %v104_v26, 4 }
 0x118   :  { %v106_v28 = vadd.f32 %v105_v27, %v104_v26 }
 0x11a   :  { %v107_v29 = vrot.slane %v106_v28, 2 }
 0x11c   :  { %v108_v30 = vadd.f32 %v107_v29, %v106_v28 }
 0x11e   :  { %v109_v31 = vrot.slane %v108_v30, 1 }
 0x120   :  { %v110_v32 = vadd.f32 %v109_v31, %v108_v30 }
 0x122   :  { %145 = vpush %v110_v32 }
 0x153   :  { %s146_s23 = spop %145 }
 0x154   :  { %v113_v33 = vstv %s146_s23 }
 0x155   :  { %115 = vst [vmem:[#allocation5] sm:$0xff] %v113_v33 }
 0x156   :  { %126 = dma.vmem_to_hbm [thread:$0]  %s122_s19, 128, %s124_s22, [#allocation4]  }
 0x157   :  { %202 = dma.done.wait [#allocation4], 128  }
 0x158   :  { %203 = vsyncadd [#allocation4], 4294967168 }
 0x159   :  { %131 = vsyncpa [#allocation3], 1 }
 0x15a   :  { %132 = vsyncpa [#allocation4], 1 }

</bundles_post_ra>
